<compile_context>
chip_gen: v7x
topology: tpu7x:2x2x1
jax: 0.10.0
libtpu: 0.0.40
codegen_flags: <defaults>
</compile_context>

<pallas_src>
import math
import functools

import jax
import jax.numpy as jnp
from jax import lax
from jax.experimental import pallas as pl
from jax.experimental.pallas import tpu as pltpu


def _attention_kernel(x_ref, wqkv_ref, bqkv_ref, wo_ref, bo_ref,
                      out_ref, probs_ref, acc_ref, *,
                      head_dim, compute_dtype):
    """One (batch, head) grid step of fused multi-head self-attention.

    x_ref:     [1, S, H]      activations (compute_dtype), resident across heads
    wqkv_ref:  [1, H, 3*hd]   per-head fused {q|k|v} projection weight
    bqkv_ref:  [1, 1, 3*hd]   per-head fused {q|k|v} bias (f32)
    wo_ref:    [1, hd, H]     per-head row-slice of output projection weight
    bo_ref:    [1, H]         output projection bias (f32)
    out_ref:   [1, S, H]      attention output block (accumulated over heads)
    probs_ref: [1, 1, S, S]   softmax attention probabilities for this head
    acc_ref:   VMEM (S, H) f32 output-projection accumulator
    """
    h = pl.program_id(1)
    hd = head_dim
    scale = 1.0 / math.sqrt(hd)

    x = x_ref[0]                                                     # [S, H]

    # Fused QKV projection for this head: one MXU pass with N = 3*hd.
    qkv = jnp.dot(x, wqkv_ref[0], preferred_element_type=jnp.float32)
    qkv = qkv + bqkv_ref[0]                                          # [S, 3*hd] f32

    # Fold 1/sqrt(hd) into q (cheaper on [S, hd] than on [S, S] scores).
    q = (qkv[:, :hd] * scale).astype(compute_dtype)
    k = qkv[:, hd:2 * hd].astype(compute_dtype)
    v = qkv[:, 2 * hd:].astype(compute_dtype)

    # scores = q @ k^T via an NT contraction — no explicit transpose of k.
    scores = lax.dot_general(q, k, (((1,), (1,)), ((), ())),
                             preferred_element_type=jnp.float32)      # [S, S]

    # Numerically stable softmax; the divide goes to the EUP as a reciprocal.
    m = jnp.max(scores, axis=-1, keepdims=True)
    e = jnp.exp(scores - m)
    denom = jnp.sum(e, axis=-1, keepdims=True)
    p = e * pl.reciprocal(denom, approx=True)

    probs_ref[0, 0] = p.astype(probs_ref.dtype)
    # (attn_dropout is identity in eval mode.)

    ctx = jnp.dot(p.astype(compute_dtype), v,
                  preferred_element_type=jnp.float32)                 # [S, hd]
    part = jnp.dot(ctx.astype(compute_dtype), wo_ref[0],
                   preferred_element_type=jnp.float32)                # [S, H]

    # Accumulate the output projection over heads (bias added once at init).
    @pl.when(h == 0)
    def _init():
        acc_ref[...] = jnp.broadcast_to(bo_ref[...], acc_ref.shape).astype(jnp.float32)

    acc_ref[...] += part

    @pl.when(h == pl.num_programs(1) - 1)
    def _finalize():
        out_ref[0] = acc_ref[...].astype(out_ref.dtype)


def attention_forward(x, params, *, num_heads,
                      compute_dtype=jnp.bfloat16, probs_dtype=jnp.float32):
    """x: [B, S, H] -> (attention_output [B, S, H], weights [B, nh, S, S])."""
    B, S, H = x.shape
    hd = H // num_heads
    wq, bq, wk, bk, wv, bv, wo, bo = params
    out_dtype = x.dtype

    # --- host-side packing (done once per call; in a model these are pre-packed) ---
    def pack_w(w):   # [H, H] (in, out) -> [nh, H, hd]
        return w.reshape(H, num_heads, hd).transpose(1, 0, 2)

    def pack_b(b):   # [1, H] -> [nh, 1, hd]
        return b.reshape(num_heads, 1, hd)

    wqkv = jnp.concatenate([pack_w(wq), pack_w(wk), pack_w(wv)],
                           axis=-1).astype(compute_dtype)             # [nh, H, 3hd]
    bqkv = jnp.concatenate([pack_b(bq), pack_b(bk), pack_b(bv)],
                           axis=-1).astype(jnp.float32)               # [nh, 1, 3hd]
    wo_h = wo.reshape(num_heads, hd, H).astype(compute_dtype)         # [nh, hd, H]
    bo_f = bo.astype(jnp.float32)                                     # [1, H]
    x_c = x.astype(compute_dtype)

    kernel = functools.partial(_attention_kernel,
                               head_dim=hd, compute_dtype=compute_dtype)

    def _nbytes(a):
        return int(a.size) * a.dtype.itemsize

    flops = B * (8 * S * H * H + 4 * num_heads * S * S * hd)
    bytes_accessed = (_nbytes(x_c) + _nbytes(wqkv) + _nbytes(bqkv)
                      + _nbytes(wo_h) + _nbytes(bo_f)
                      + B * S * H * jnp.dtype(out_dtype).itemsize
                      + B * num_heads * S * S * jnp.dtype(probs_dtype).itemsize)

    return pl.pallas_call(
        kernel,
        grid=(B, num_heads),
        in_specs=[
            pl.BlockSpec((1, S, H), lambda b, h: (b, 0, 0)),          # x (constant across h)
            pl.BlockSpec((1, H, 3 * hd), lambda b, h: (h, 0, 0)),     # fused qkv weight slab
            pl.BlockSpec((1, 1, 3 * hd), lambda b, h: (h, 0, 0)),     # fused qkv bias
            pl.BlockSpec((1, hd, H), lambda b, h: (h, 0, 0)),         # out-proj weight slice
            pl.BlockSpec((1, H), lambda b, h: (0, 0)),                # out-proj bias
        ],
        out_specs=(
            pl.BlockSpec((1, S, H), lambda b, h: (b, 0, 0)),          # attention output
            pl.BlockSpec((1, 1, S, S), lambda b, h: (b, h, 0, 0)),    # attention probs
        ),
        out_shape=(
            jax.ShapeDtypeStruct((B, S, H), out_dtype),
            jax.ShapeDtypeStruct((B, num_heads, S, S), probs_dtype),
        ),
        scratch_shapes=[pltpu.VMEM((S, H), jnp.float32)],
        compiler_params=pltpu.CompilerParams(
            dimension_semantics=("parallel", "arbitrary")),
        cost_estimate=pl.CostEstimate(
            flops=flops,
            transcendentals=B * num_heads * S * S,
            bytes_accessed=bytes_accessed),
    )(x_c, wqkv, bqkv, wo_h, bo_f)


def _reference(x, params, *, num_heads):
    """Pure-JAX f32 reference mirroring the PyTorch forward (eval mode)."""
    B, S, H = x.shape
    hd = H // num_heads
    wq, bq, wk, bk, wv, bv, wo, bo = params
    xf = x.astype(jnp.float32)

    def split(t):  # [B,S,H] -> [B,nh,S,hd]
        return t.reshape(B, S, num_heads, hd).transpose(0, 2, 1, 3)

    q = split(xf @ wq + bq)
    k = split(xf @ wk + bk)
    v = split(xf @ wv + bv)
    scores = jnp.einsum("bhqd,bhkd->bhqk", q, k) / math.sqrt(hd)
    probs = jax.nn.softmax(scores, axis=-1)
    ctx = jnp.einsum("bhqk,bhkd->bhqd", probs, v)
    ctx = ctx.transpose(0, 2, 1, 3).reshape(B, S, H)
    out = ctx @ wo + bo
    return out.astype(x.dtype), probs


if __name__ == "__main__":
    # Small config consistent with the module: hidden=32, heads=4, seq=8, batch=2.
    B, S, H = 2, 8, 32
    NUM_HEADS = 4

    key = jax.random.PRNGKey(0)
    keys = jax.random.split(key, 9)
    x = jax.random.normal(keys[0], (B, S, H), dtype=jnp.float32)

    def lin_init(kw, kb):
        w = jax.random.normal(kw, (H, H), dtype=jnp.float32) * 0.05   # [in, out]
        b = jax.random.normal(kb, (1, H), dtype=jnp.float32) * 0.01
        return w, b

    wq, bq = lin_init(keys[1], keys[2])
    wk, bk = lin_init(keys[3], keys[4])
    wv, bv = lin_init(keys[5], keys[6])
    wo, bo = lin_init(keys[7], keys[8])
    params = (wq, bq, wk, bk, wv, bv, wo, bo)

    out, weights = attention_forward(x, params, num_heads=NUM_HEADS)
    out = jax.block_until_ready(out)
    weights = jax.block_until_ready(weights)

    ref_out, ref_weights = _reference(x, params, num_heads=NUM_HEADS)
    assert out.shape == (B, S, H)
    assert weights.shape == (B, NUM_HEADS, S, S)
    # bf16 MXU operands + approx reciprocal -> looser tolerances vs f32 reference.
    assert jnp.allclose(out, ref_out, atol=2e-2, rtol=2e-2), "output mismatch"
    assert jnp.allclose(weights, ref_weights, atol=2e-2, rtol=2e-2), "probs mismatch"

    print("KERNEL_OK")
</pallas_src>

<mosaic_0001>
module attributes {stable_mosaic.version = 11 : i64} {
  func.func @_attention_kernel(%arg0: i32, %arg1: i32, %arg2: memref<1x8x32xbf16, #tpu.memory_space<vmem>>, %arg3: memref<1x32x24xbf16, #tpu.memory_space<vmem>>, %arg4: memref<1x1x24xf32, #tpu.memory_space<vmem>>, %arg5: memref<1x8x32xbf16, #tpu.memory_space<vmem>>, %arg6: memref<1x32xf32, #tpu.memory_space<vmem>>, %arg7: memref<1x8x32xf32, #tpu.memory_space<vmem>>, %arg8: memref<1x1x8x8xf32, #tpu.memory_space<vmem>>, %arg9: memref<8x32xf32, #tpu.memory_space<vmem>>) attributes {dimension_semantics = [#tpu.dimension_semantics<parallel>, #tpu.dimension_semantics<arbitrary>], iteration_bounds = array<i64: 2, 4>, scalar_prefetch = 0 : i64, scratch_operands = 1 : i64, tpu.core_type = #tpu.core_type<tc>, window_params = [{transform_indices = @transform_0, window_bounds = array<i64: 1, 8, 32>}, {transform_indices = @transform_1, window_bounds = array<i64: 1, 32, 24>}, {transform_indices = @transform_2, window_bounds = array<i64: 1, 1, 24>}, {transform_indices = @transform_3, window_bounds = array<i64: 1, 8, 32>}, {pipeline_mode = #tpu.pipeline_mode<synchronous>, transform_indices = @transform_4, window_bounds = array<i64: 1, 32>}, {transform_indices = @transform_5, window_bounds = array<i64: 1, 8, 32>}, {transform_indices = @transform_6, window_bounds = array<i64: 1, 1, 8, 8>}]} {
    %c0 = arith.constant 0 : index
    %c0_0 = arith.constant 0 : index
    %c0_1 = arith.constant 0 : index
    %0 = vector.load %arg2[%c0, %c0_0, %c0_1] : memref<1x8x32xbf16, #tpu.memory_space<vmem>>, vector<1x8x32xbf16>
    %1 = vector.shape_cast %0 : vector<1x8x32xbf16> to vector<8x32xbf16>
    %c0_2 = arith.constant 0 : index
    %c0_3 = arith.constant 0 : index
    %c0_4 = arith.constant 0 : index
    %2 = vector.load %arg3[%c0_2, %c0_3, %c0_4] : memref<1x32x24xbf16, #tpu.memory_space<vmem>>, vector<1x32x24xbf16>
    %3 = vector.shape_cast %2 : vector<1x32x24xbf16> to vector<32x24xbf16>
    %cst = arith.constant dense<0.000000e+00> : vector<8x24xf32>
    %4 = tpu.matmul %1, %3, %cst {dimension_numbers = #tpu.dot_dimension_numbers<[1], [0], [0], [1], [0, 0, 1, 1], [], []>} : vector<8x32xbf16>, vector<32x24xbf16>, vector<8x24xf32> -> vector<8x24xf32>
    %c0_5 = arith.constant 0 : index
    %c0_6 = arith.constant 0 : index
    %c0_7 = arith.constant 0 : index
    %5 = vector.load %arg4[%c0_5, %c0_6, %c0_7] : memref<1x1x24xf32, #tpu.memory_space<vmem>>, vector<1x1x24xf32>
    %6 = vector.shape_cast %5 : vector<1x1x24xf32> to vector<1x24xf32>
    %7 = vector.broadcast %6 : vector<1x24xf32> to vector<8x24xf32>
    %8 = arith.addf %4, %7 : vector<8x24xf32>
    %9 = vector.extract_strided_slice %8 {offsets = [0, 0], sizes = [8, 8], strides = [1, 1]} : vector<8x24xf32> to vector<8x8xf32>
    %cst_8 = arith.constant 0.353553385 : f32
    %10 = vector.broadcast %cst_8 : f32 to vector<8x8xf32>
    %11 = arith.mulf %9, %10 : vector<8x8xf32>
    %12 = arith.truncf %11 : vector<8x8xf32> to vector<8x8xbf16>
    %13 = vector.extract_strided_slice %8 {offsets = [0, 8], sizes = [8, 8], strides = [1, 1]} : vector<8x24xf32> to vector<8x8xf32>
    %14 = arith.truncf %13 : vector<8x8xf32> to vector<8x8xbf16>
    %15 = vector.extract_strided_slice %8 {offsets = [0, 16], sizes = [8, 8], strides = [1, 1]} : vector<8x24xf32> to vector<8x8xf32>
    %16 = arith.truncf %15 : vector<8x8xf32> to vector<8x8xbf16>
    %cst_9 = arith.constant dense<0.000000e+00> : vector<8x8xf32>
    %17 = tpu.matmul %12, %14, %cst_9 {dimension_numbers = #tpu.dot_dimension_numbers<[1], [1], [0], [0], [0, 0, 1, 0], [], []>} : vector<8x8xbf16>, vector<8x8xbf16>, vector<8x8xf32> -> vector<8x8xf32>
    %cst_10 = arith.constant dense<0xFF800000> : vector<8xf32>
    %18 = vector.multi_reduction <maximumf>, %17, %cst_10 [1] : vector<8x8xf32> to vector<8xf32>
    %19 = vector.shape_cast %18 : vector<8xf32> to vector<8x1xf32>
    %20 = vector.broadcast %19 : vector<8x1xf32> to vector<8x8xf32>
    %21 = arith.subf %17, %20 : vector<8x8xf32>
    %22 = math.exp %21 : vector<8x8xf32>
    %cst_11 = arith.constant dense<0.000000e+00> : vector<8xf32>
    %23 = vector.multi_reduction <add>, %22, %cst_11 [1] : vector<8x8xf32> to vector<8xf32>
    %24 = vector.shape_cast %23 : vector<8xf32> to vector<8x1xf32>
    %25 = tpu.reciprocal %24 {approx = true} : vector<8x1xf32> -> vector<8x1xf32>
    %26 = vector.broadcast %25 : vector<8x1xf32> to vector<8x8xf32>
    %27 = arith.mulf %22, %26 : vector<8x8xf32>
    %c0_12 = arith.constant 0 : index
    %c0_13 = arith.constant 0 : index
    %c0_14 = arith.constant 0 : index
    %c0_15 = arith.constant 0 : index
    %28 = vector.load %arg8[%c0_12, %c0_13, %c0_14, %c0_15] : memref<1x1x8x8xf32, #tpu.memory_space<vmem>>, vector<1x1x8x8xf32>
    %29 = vector.shape_cast %28 : vector<1x1x8x8xf32> to vector<8x8xf32>
    %30 = vector.shape_cast %27 : vector<8x8xf32> to vector<1x1x8x8xf32>
    tpu.vector_store %arg8[%c0_12, %c0_13, %c0_14, %c0_15], %30 {strides = array<i32>} : memref<1x1x8x8xf32, #tpu.memory_space<vmem>>, vector<1x1x8x8xf32>,
    %31 = arith.truncf %27 : vector<8x8xf32> to vector<8x8xbf16>
    %cst_16 = arith.constant dense<0.000000e+00> : vector<8x8xf32>
    %32 = tpu.matmul %31, %16, %cst_16 {dimension_numbers = #tpu.dot_dimension_numbers<[1], [0], [0], [1], [0, 0, 1, 1], [], []>} : vector<8x8xbf16>, vector<8x8xbf16>, vector<8x8xf32> -> vector<8x8xf32>
    %33 = arith.truncf %32 : vector<8x8xf32> to vector<8x8xbf16>
    %c0_17 = arith.constant 0 : index
    %c0_18 = arith.constant 0 : index
    %c0_19 = arith.constant 0 : index
    %34 = vector.load %arg5[%c0_17, %c0_18, %c0_19] : memref<1x8x32xbf16, #tpu.memory_space<vmem>>, vector<1x8x32xbf16>
    %35 = vector.shape_cast %34 : vector<1x8x32xbf16> to vector<8x32xbf16>
    %cst_20 = arith.constant dense<0.000000e+00> : vector<8x32xf32>
    %36 = tpu.matmul %33, %35, %cst_20 {dimension_numbers = #tpu.dot_dimension_numbers<[1], [0], [0], [1], [0, 0, 1, 1], [], []>} : vector<8x8xbf16>, vector<8x32xbf16>, vector<8x32xf32> -> vector<8x32xf32>
    %c0_i32 = arith.constant 0 : i32
    %37 = arith.cmpi eq, %arg1, %c0_i32 : i32
    %38 = arith.extui %37 : i1 to i32
    %c0_i32_21 = arith.constant 0 : i32
    %39 = arith.cmpi ne, %38, %c0_i32_21 : i32
    scf.if %39 {
      %c0_27 = arith.constant 0 : index
      %c0_28 = arith.constant 0 : index
      %46 = vector.load %arg6[%c0_27, %c0_28] : memref<1x32xf32, #tpu.memory_space<vmem>>, vector<1x32xf32>
      %47 = vector.shape_cast %46 : vector<1x32xf32> to vector<1x32xf32>
      %48 = vector.broadcast %47 : vector<1x32xf32> to vector<8x32xf32>
      %c0_29 = arith.constant 0 : index
      %c0_30 = arith.constant 0 : index
      %49 = vector.load %arg9[%c0_29, %c0_30] : memref<8x32xf32, #tpu.memory_space<vmem>>, vector<8x32xf32>
      tpu.vector_store %arg9[%c0_29, %c0_30], %48 {strides = array<i32>} : memref<8x32xf32, #tpu.memory_space<vmem>>, vector<8x32xf32>,
    } else {
    }
    %c0_22 = arith.constant 0 : index
    %c0_23 = arith.constant 0 : index
    %40 = vector.load %arg9[%c0_22, %c0_23] : memref<8x32xf32, #tpu.memory_space<vmem>>, vector<8x32xf32>
    %41 = arith.addf %40, %36 : vector<8x32xf32>
    %c0_24 = arith.constant 0 : index
    %c0_25 = arith.constant 0 : index
    %42 = vector.load %arg9[%c0_24, %c0_25] : memref<8x32xf32, #tpu.memory_space<vmem>>, vector<8x32xf32>
    tpu.vector_store %arg9[%c0_24, %c0_25], %41 {strides = array<i32>} : memref<8x32xf32, #tpu.memory_space<vmem>>, vector<8x32xf32>,
    %c3_i32 = arith.constant 3 : i32
    %43 = arith.cmpi eq, %arg1, %c3_i32 : i32
    %44 = arith.extui %43 : i1 to i32
    %c0_i32_26 = arith.constant 0 : i32
    %45 = arith.cmpi ne, %44, %c0_i32_26 : i32
    scf.if %45 {
      %c0_27 = arith.constant 0 : index
      %c0_28 = arith.constant 0 : index
      %46 = vector.load %arg9[%c0_27, %c0_28] : memref<8x32xf32, #tpu.memory_space<vmem>>, vector<8x32xf32>
      %c0_29 = arith.constant 0 : index
      %c0_30 = arith.constant 0 : index
      %c0_31 = arith.constant 0 : index
      %47 = vector.load %arg7[%c0_29, %c0_30, %c0_31] : memref<1x8x32xf32, #tpu.memory_space<vmem>>, vector<1x8x32xf32>
      %48 = vector.shape_cast %47 : vector<1x8x32xf32> to vector<8x32xf32>
      %49 = vector.shape_cast %46 : vector<8x32xf32> to vector<1x8x32xf32>
      tpu.vector_store %arg7[%c0_29, %c0_30, %c0_31], %49 {strides = array<i32>} : memref<1x8x32xf32, #tpu.memory_space<vmem>>, vector<1x8x32xf32>,
    } else {
    }
    return
  }
  func.func @transform_0(%arg0: i32, %arg1: i32) -> (i32, i32, i32) {
    %c0_i32 = arith.constant 0 : i32
    %c0_i32_0 = arith.constant 0 : i32
    %c0_i32_1 = arith.constant 0 : i32
    return %arg0, %c0_i32, %c0_i32_0 : i32, i32, i32
  }
  func.func @transform_1(%arg0: i32, %arg1: i32) -> (i32, i32, i32) {
    %c0_i32 = arith.constant 0 : i32
    %c0_i32_0 = arith.constant 0 : i32
    %c0_i32_1 = arith.constant 0 : i32
    return %arg1, %c0_i32, %c0_i32_0 : i32, i32, i32
  }
  func.func @transform_2(%arg0: i32, %arg1: i32) -> (i32, i32, i32) {
    %c0_i32 = arith.constant 0 : i32
    %c0_i32_0 = arith.constant 0 : i32
    %c0_i32_1 = arith.constant 0 : i32
    return %arg1, %c0_i32, %c0_i32_0 : i32, i32, i32
  }
  func.func @transform_3(%arg0: i32, %arg1: i32) -> (i32, i32, i32) {
    %c0_i32 = arith.constant 0 : i32
    %c0_i32_0 = arith.constant 0 : i32
    %c0_i32_1 = arith.constant 0 : i32
    return %arg1, %c0_i32, %c0_i32_0 : i32, i32, i32
  }
  func.func @transform_4(%arg0: i32, %arg1: i32) -> (i32, i32) {
    %c0_i32 = arith.constant 0 : i32
    %c0_i32_0 = arith.constant 0 : i32
    %c0_i32_1 = arith.constant 0 : i32
    return %c0_i32, %c0_i32_0 : i32, i32
  }
  func.func @transform_5(%arg0: i32, %arg1: i32) -> (i32, i32, i32) {
    %c0_i32 = arith.constant 0 : i32
    %c0_i32_0 = arith.constant 0 : i32
    %c0_i32_1 = arith.constant 0 : i32
    return %arg0, %c0_i32, %c0_i32_0 : i32, i32, i32
  }
  func.func @transform_6(%arg0: i32, %arg1: i32) -> (i32, i32, i32, i32) {
    %c0_i32 = arith.constant 0 : i32
    %c0_i32_0 = arith.constant 0 : i32
    %c0_i32_1 = arith.constant 0 : i32
    return %arg0, %arg1, %c0_i32, %c0_i32_0 : i32, i32, i32, i32
  }
}

</mosaic_0001>

<bundles_post_ra>
// kernel: tpu_custom_call.1
= control target key start
LH: loop header
LB: loop body
LE: loop exit
PB: predicated region body
PF: predicated region fallthrough
CT: control target
= control target key end

     0   :  { %s1379_s0 = inlined_call_operand.vmem [shape: bf16[2,8,32], index: 0, kind: input, shape index: {}]   ;;  %s1380_s1 = inlined_call_operand.vmem [shape: bf16[4,32,24], index: 1, kind: input, shape index: {}]   ;;  %s1381_s2 = inlined_call_operand.vmem [shape: f32[4,1,24], index: 2, kind: input, shape index: {}]   ;;  %s1382_s3 = inlined_call_operand.vmem [shape: bf16[4,8,32], index: 3, kind: input, shape index: {}]   ;;  %s1383_s4 = inlined_call_operand.vmem [shape: f32[1,32], index: 4, kind: input, shape index: {}]   ;;  %s1384_s5 = inlined_call_operand.hbm [shape: f32[2,8,32], index: 5, kind: output, shape index: {0}]   ;;  %s1385_s6 = inlined_call_operand.hbm [shape: f32[2,4,8,8], index: 6, kind: output, shape index: {1}]  }
   0x1   :  { %1394 = sst [smem:[#allocation16_spill]] %s1379_s0 }
   0x2   :  { %1395 = sst [smem:[#allocation17_spill]] %s1380_s1 }
   0x3   :  { %12 = vsyncpa [#allocation4], 0 }
   0x4   :  { %14 = vsyncpa [#allocation4 + $0x1], 0 }
   0x5   :  { %15 = vsyncpa [#allocation6], 0 }
   0x6   :  { %17 = vsyncpa [#allocation6 + $0x1], 0  ;;  %s1114_s21 = smov 0   ;;  %s1116_s22 = smov 0  }
   0x7   :  { %s1118_s23 = smov 0   ;;  %s1120_s24 = smov 0  }
   0x8   :  { %s1122_s25 = smov 0   ;;  %s1124_s26 = smov 0  }
   0x9   :  { %s1126_s27 = smov 0   ;;  %s1128_s28 = smov 0  }
   0xa   :  { %s1130_s29 = smov 0   ;;  %s1132_s30 = smov 0  }
   0xb   :  { %s1134_s7 = smov 0  }
   0xc LB: > { %1396 = sst [smem:[#allocation9_spill]] %s1051_s26  ;;  %s747_s8 = sadd.s32 4294967295, %s1071_s7   ;;  %s1071_s7 = sphi %s1134_s7, %s23_s7   ;;  %s1067_s30 = sphi %s1132_s30, %s1421_s30   ;;  %s1063_s29 = sphi %s1130_s29, %s1420_s29   ;;  %s1059_s28 = sphi %s1128_s28, %s1419_s28   ;;  %s1055_s27 = sphi %s1126_s27, %s1418_s27   ;;  %s1051_s26 = sphi %s1124_s26, %s1417_s26   ;;  %s1047_s25 = sphi %s1122_s25, %s1426_s25   ;;  %s1043_s24 = sphi %s1120_s24, %s1425_s24   ;;  %s1039_s23 = sphi %s1118_s23, %s1424_s23   ;;  %s1035_s22 = sphi %s1116_s22, %s1423_s22   ;;  %s1031_s21 = sphi %s1114_s21, %s1422_s21  }
   0xd   : > { %1397 = sst [smem:[#allocation10_spill]] %s1063_s29  ;;  %s748_s9 = sadd.s32 4294967294, %s1071_s7  }
   0xe   : > { %1398 = sst [smem:[#allocation11_spill]] %s1067_s30  ;;  %s32_s10 = sadd.s32 1, %s1063_s29 }
   0xf   : > { %s35_s11 = sadd.s32 1, %s1067_s30  ;;  %p33_p0 = scmp.ge.s32.totalorder %s32_s10, 4 }
  0x10   : > { %s167_s12 = sadd.s32 1, %s1051_s26  ;;  %p177_p1 = scmp.ne.s32.totalorder %s1051_s26, %s1047_s25 }
  0x11   : > { %p1176_p2 = scmp.eq.s32.totalorder %s747_s8, 7  ;;  %s1428_s10 = smov (%p33_p0, %s32_s10), 0 }
  0x12   : > { %1400 = sst [smem:[#allocation12_spill]] %s1428_s10  ;;  %s1430_s11 = smov (!%p33_p0, %s35_s11), %s1067_s30 }
  0x13   : > { %p1185_p3 = por %p1176_p2, %p177_p1  ;;  %p183_p4 = scmp.ne.s32.totalorder %s1047_s25, %s1043_s24 }
  0x14   : > { %p37_p5 = scmp.ge.s32.totalorder %s1430_s11, 2  ;;  %p1191_p6 = scmp.eq.s32.totalorder %s748_s9, 7 }
  0x15   : > { %s191_s16 = ssub.s32 %s1063_s29, %s1428_s10  ;;  %s195_s17 = sadd.s32 1, %s1039_s23 }
  0x16   : > { %s1432_s11 = smov (%p37_p5, %s1430_s11), 0  ;;  %p1202_p7 = por %p1191_p6, %p183_p4 }
  0x17   : > { %1403 = sst [smem:[#allocation13_spill]] %s1432_s11  ;;  %p205_p8 = scmp.ne.s32.totalorder %s1039_s23, %s1035_s22 }
  0x18   : > { %s164_s19 = ssub.s32 %s1067_s30, %s1432_s11  ;;  %p211_p9 = scmp.ne.s32.totalorder %s1035_s22, %s1031_s21 }
  0x19   : > { %p165_p10 = scmp.eq.s32.totalorder %s164_s19, 0  ;;  %s192_s20 = sor.u32 %s191_s16, %s164_s19 }
  0x1a   : > { %p193_p11 = scmp.eq.s32.totalorder %s192_s20, 0  ;;  %p1214_p12 = por %p205_p8, %p1176_p2 }
  0x1b   : > { %s1219_s9 = scalar_select %p165_p10, %s1051_s26, %s167_s12  }
  0x1c   : > { %s1222_s10 = scalar_select %p193_p11, %s1039_s23, %s195_s17  }
  0x1d   : > { %1406 = sst [smem:[#allocation14_spill]] %s1219_s9  ;;  %p1226_p13 = por %p211_p9, %p1191_p6 }
  0x1e   : > { %1407 = sst [smem:[#allocation15_spill]] %s1222_s10  ;;  %p751_p0 = scmp.ge.s32.totalorder %s1071_s7, 1 }
  0x1f   : > { %s1408_s29 = scalar_select %p1226_p13, 1, 0 }
  0x20   : > { %p261_p1 = scmp.lt.s32.totalorder %s1071_s7, 9 }
  0x22   : > { %p262_p4 = pnand %p751_p0, %p261_p1 }
  0x23   : > { %s1388_s13 = sand.u32 (!%p262_p4), 1, %s1047_s25   ;;  %p311_p2 = scmp.lt.s32.totalorder (!%p262_p4), %s1055_s27, 3  ;;  %v1073_v0 = vmov (!%p262_p4), 0.0   ;;  %vm1074_vm0 = vmmov (!%p262_p4), 0   ;;  %vm348_vm1 = vcmask (!%p262_p4), 261120   ;;  %vm398_vm2 = vcmask (!%p262_p4), 64512  }
  0x24   : > { %265 = sbr.rel (%p262_p4) target bundleno = 1414 (0x586), region = 40  ;;  %s1236_s12 = sshll.u32 (!%p262_p4), %s1388_s13, 3  ;;  %785 = vmatprep.subr.bf16.mxu0 (!%p262_p4), %v1073_v0  ;;  %789 = vmatprep.mubr.msk.bf16.mxu0 (!%p262_p4), %vm1074_vm0, %v1073_v0  ;;  %vm463_vm3 = vcmask (!%p262_p4), 1043456  }
  0x25   : > { %p307_p5 = scmp.lt.s32.totalorder (!%p262_p4), %s1059_s28, 1  ;;  %793 = vmatprep.subr.bf16.mxu1 (!%p262_p4), %v1073_v0  ;;  %795 = vmatprep.mubr.msk.bf16.mxu1 (!%p262_p4), %vm1074_vm0, %v1073_v0  ;;  %s1409_s1 = sld [smem:[#allocation17_spill]] (!%p262_p4) }
  0x26   : > { %s1410_s0 = sld [smem:[#allocation16_spill]] (!%p262_p4)  ;;  %s1075_s30 = smov (!%p262_p4), 120  }
  0x27   : > { %s299_s19 = scalar_lea.vmem (!%p262_p4), [#allocation3], %s1236_s12  ;;  %p765_p6 = scmp.ne.s32.totalorder (!%p262_p4), %s1055_s27, 0 }
  0x2b   : > { %s1242_s15 = scalar_select %p311_p2, %s1055_s27, 3 }
  0x2c   : > { %s308_s16 = scalar_select %p307_p5, %s1059_s28, 1 }
  0x2d   : > { %s775_s17 = sshll.u32 %s1242_s15, 4  ;;  %s757_s10 = sshll.u32 %s1242_s15, 2  ;;  %v766_v42 = vld [vmem:[%s1383_s4] ss:$0 sm:$0xff] (!%p765_p6) }
  0x2e   : > { %s315_s13 = scalar_lea.vmem %s1409_s1, %s775_s17  ;;  %s754_s11 = sshll.u32 %s308_s16, 2  ;;  %566 = vst.msk [vmem:[#allocation2] sm:$0xff] (!%p765_p6), %vm348_vm1, %v766_v42 }
  0x2f   : > { %v915_v1 = vld [vmem:[%s315_s13] sm:$0xff]   ;;  %v916_v2 = vld [vmem:[%s315_s13 + $0x8] sm:$0xff]   ;;  %s310_s26 = scalar_lea.vmem %s1410_s0, %s754_s11  ;;  %s318_s17 = scalar_lea.vmem %s1381_s2, %s1242_s15 }
  0x30   : > { %786 = vmatpush3.bf16.msra.mxu0 %v915_v1  ;;  %v324_v3 = vld [vmem:[%s310_s26] sm:$0xf]  ;;  %s1076_s26 = smov 112   ;;  %s322_s13 = scalar_lea.vmem %s1382_s3, %s757_s10 }
  0x31   : > { %787 = vmatprep.subr.bf16.mxu0 %v1073_v0  ;;  %v758_v4 = vld [vmem:[%s318_s17] ss:$0 sm:$0xff]  ;;  %s1392_s16 = sand.u32 1, %s1035_s22  }
  0x32   : > { %v508_v25 = vld [vmem:[%s322_s13] sm:$0xf]  ;;  %s1270_s20 = sshll.u32 %s1392_s16, 3 }
  0x33   : > { %v513_v26 = vsel %vm463_vm3, %v508_v25, 0  ;;  %s1393_s15 = scalar_lea.vmem [#allocation5], %s1270_s20 }
  0x34   : > { %788 = vmatpush3.bf16.msra.mxu0 %v916_v2 }
  0x35   : > { %799 = vmatprep.subr.bf16.mxu0 %v1073_v0 }
  0x37   : > { %790 = vmatmul.mubr.msk.bf16.vlgmr.msra.gmra.mrb[0].mxu0 %vm348_vm1, %v324_v3 }
  0x38   : > { %801 = vmatprep.mubr.msk.bf16.mxu0 %vm1074_vm0, %v1073_v0 }
 0x10a   : > { %v386_v5 = vpop.f32.mrb[0].mxu0 }
 0x10b   : > { %v387_v6 = vadd.f32 %v758_v4, %v386_v5  ;;  %v791_v7 = vpop.f32.mrb[1].mxu0 }
 0x10c   : > { %v389_v8 = vpop.f32.mrb[2].mxu0 }
 0x10d   : > { %v792_v9 = vpop.f32.mrb[3].mxu0  ;;  %v394_v10 = vpack.c.bf16 %v387_v6, %v387_v6  ;;  %v392_v13 = vmul.f32 0.35355338, %v387_v6 }
 0x10f   : > { %396 = vrot.lane.b32.xlu0 %v394_v10, %s1075_s30  ;;  %v393_v14 = vpack.c.bf16 %v392_v13, %v392_v13 }
 0x181   : > { %v397_v11 = vpop.permute.xlu0 %396 }
 0x182   : > { %v403_v12 = vsel %vm398_vm2, %v397_v11, 0 }
 0x183   : > { %794 = vmatpush3.bf16.xpose.msra.mxu1 %v403_v12 }
 0x184   : > { %805 = vmatprep.subr.bf16.mxu1 %v1073_v0 }
 0x18a   : > { %796 = vmatmul.mubr.msk.bf16.vlgmr.msra.gmra.mrb[0].mxu1 %vm398_vm2, %v393_v14 }
 0x18b   : > { %807 = vmatprep.mubr.msk.bf16.mxu1 %vm1074_vm0, %v1073_v0  ;;  %806 = vmatpush3.bf16.msra.mxu1 %v513_v26 }
 0x25d   : > { %v439_v15 = vpop.f32.mrb[0].mxu1 }
 0x25e   : > { %v797_v16 = vpop.f32.mrb[1].mxu1  ;;  %v445_v17 = vsel %vm398_vm2, %v439_v15, -inf }
 0x25f   : > { %446 = vmax.xlane.f32.xlu0 %v445_v17  ;;  %v442_v18 = vpop.f32.mrb[2].mxu1 }
 0x260   : > { %v798_v19 = vpop.f32.mrb[3].mxu1 }
 0x2ec   : > { %v447_v20 = vpop.xlane.xlu0 %446 }
 0x2ed   : > { %v448_v21 = vsub.f32 %v439_v15, %v447_v20 }
 0x2ef   : > { %v449_v22 = vmul.f32 1.442695, %v448_v21 }
 0x2f1   : > { %917 = vpow2.f32 %v449_v22 }
 0x2fb   : > { %v918_v23 = vpop.eup %917 }
 0x2fc   : > { %v451_v24 = vsel %vm398_vm2, %v918_v23, 0.0 }
 0x2fd   : > { %452 = vadd.xlane.f32.xlu1 %v451_v24 }
 0x30e   : > { %458 = vrot.lane.b32.xlu1 %v394_v10, %s1076_s26 }
 0x38a   : > { %v453_v27 = vpop.xlane.xlu1 %452 }
 0x38b   : > { %919 = vrcp.f32 %v453_v27 }
 0x38e   : > { %v459_v28 = vpop.permute.xlu1 %458 }
 0x38f   : > { %v465_v29 = vsel %vm463_vm3, %v459_v28, 0 }
 0x390   : > { %800 = vmatpush3.bf16.msra.mxu0 %v465_v29 }
 0x395   : > { %v920_v30 = vpop.eup %919 }
 0x396   : > { %v455_v31 = vmul.f32 %v920_v30, %v918_v23 }
 0x398   : > { %456 = vst.msk [vmem:[%s1393_s15] sm:$0xff] %vm398_vm2, %v455_v31  ;;  %v457_v32 = vpack.c.bf16 %v455_v31, %v455_v31 }
 0x39a   : > { %802 = vmatmul.mubr.msk.bf16.vlgmr.msra.gmra.mrb[4].mxu0 %vm398_vm2, %v457_v32 }
 0x46d   : > { %v501_v33 = vpop.f32.mrb[4].mxu0 }
 0x46e   : > { %v507_v34 = vpack.c.bf16 %v501_v33, %v501_v33  ;;  %v803_v35 = vpop.f32.mrb[5].mxu0 }
 0x46f   : > { %v504_v36 = vpop.f32.mrb[6].mxu0 }
 0x470   : > { %v804_v37 = vpop.f32.mrb[7].mxu0  ;;  %808 = vmatmul.mubr.msk.bf16.vlgmr.msra.gmra.mrb[4].mxu1 %vm398_vm2, %v507_v34 }
 0x540   : > { %558 = sbr.rel (%p765_p6) target bundleno = 1351 (0x547), region = 44 }
 0x543   : > { %v549_v38 = vpop.f32.mrb[4].mxu1 }
 0x544   : > { %v809_v39 = vpop.f32.mrb[5].mxu1 }
 0x545   : > { %v552_v40 = vpop.f32.mrb[6].mxu1 }
 0x546   : > { %v810_v41 = vpop.f32.mrb[7].mxu1 }
 0x547 PF: > { %v567_v43 = vld [vmem:[#allocation2] sm:$0xff]  ;;  %p767_p8 = scmp.ne.s32.totalorder %s1055_s27, 3 }
 0x548   : > { %v568_v44 = vadd.f32 %v567_v43, %v549_v38 }
 0x549   : > { %573 = sbr.rel (%p767_p8) target bundleno = 1363 (0x553), region = 48 }
 0x54a   : > { %569 = vst.msk [vmem:[#allocation2] sm:$0xff] %vm348_vm1, %v568_v44 }
 0x551   : > { %v574_v45 = vld [vmem:[#allocation2] sm:$0xff] }
 0x552   : > { %575 = vst.msk [vmem:[%s299_s19] sm:$0xff] %vm348_vm1, %v574_v45 }
 0x553 PF: > { %s770_s12 = sshll.u32 %s1059_s28, 7  ;;  %s595_s9 = sshll.u32 %s299_s19, 4  ;;  %s596_s9 = int_to_ptr.vmem [resolvable:$true] %s595_s9 }
 0x554   : > { %s1291_s11 = scalar_lea.hbm %s1384_s5, %s770_s12  ;;  %s1411_s13 = sand.u32 1, %s1047_s25  }
 0x555   : > { %s577_s17 = scalar_lea.sflag [#allocation4], %s1411_s13  ;;  %s921_s30 = scalar_lea.vmem %s596_s9, 128 }
 0x556   : > { %p922_p9 = scmp.ne.s32.totalorder %s596_s9, %s921_s30  ;;  %s1077_s16 = smov [#allocation3]  }
 0x557   : > { %s925_s15 = sshll.u32 %s1077_s16, 4  ;;  %s926_s15 = int_to_ptr.vmem [resolvable:$false] %s925_s15 }
 0x558   : > { %p923_p10 = pnand %p922_p9, %p1185_p3  ;;  %s927_s0 = scalar_lea.vmem %s926_s15, 256 }
 0x559   : > { %p928_p0 = scmp.lt.s32.totalorder %s596_s9, %s926_s15  ;;  %p929_p1 = scmp.lt.s32.totalorder %s927_s0, %s921_s30 }
 0x55a   : > { %p924_p11 = pneg %p923_p10 }
 0x55b   : > { %p930_p4 = por %p929_p1, %p928_p0 }
 0x55d   : > { %p931_p2 = pnand %p930_p4, %p924_p11 }
 0x55f   : > { %934 = shalt.err (!%p931_p2)
}
 0x560   : > { %s935_s19 = scalar_lea.hbm %s1291_s11, 128  ;;  %s939_s16 = scalar_lea.hbm %s1384_s5, 256 }
 0x561   : > { %p936_p5 = scmp.ne.s32.totalorder %s1291_s11, %s935_s19  ;;  %p940_p9 = scmp.lt.u32.totalorder %s1291_s11, %s1384_s5 }
 0x562   : > { %p941_p10 = scmp.lt.u32.totalorder %s939_s16, %s935_s19  ;;  %p943_p0 = scmp.lt.u32.totalorder %s935_s19, %s1291_s11 }
 0x563   : > { %p937_p6 = pnand %p936_p5, %p1185_p3 }
 0x564   : > { %p942_p11 = por %p941_p10, %p940_p9 }
 0x565   : > { %p938_p8 = pneg %p937_p6 }
 0x566   : > { %p944_p1 = por %p943_p0, %p942_p11 }
 0x568   : > { %p945_p4 = pnand %p944_p1, %p938_p8 }
 0x56a   : > { %948 = shalt.err (!%p945_p4)
}
 0x56b   : > { %811 = dma.vmem_to_hbm [thread:$0]  (%p1185_p3), %s596_s9, 128, %s1291_s11, %s577_s17  }
 0x56c   : > { %s771_s0 = sshll.u32 %s1059_s28, 2  ;;  %s1412_s13 = scalar_lea.vmem [#allocation5], %s1270_s20 }
 0x56d   : > { %s610_s30 = sshll.u32 %s1412_s13, 4  ;;  %s606_s12 = sadd.s32 %s1055_s27, %s771_s0  ;;  %s1316_s30 = int_to_ptr.vmem [resolvable:$true] %s610_s30 }
 0x56e   : > { %s772_s19 = sshll.u32 %s606_s12, 7  ;;  %s1413_s10 = sand.u32 1, %s1035_s22  }
 0x56f   : > { %s608_s14 = scalar_lea.hbm %s1385_s6, %s772_s19  ;;  %s582_s15 = scalar_lea.sflag [#allocation6], %s1413_s10 }
 0x570   : > { %s949_s1 = scalar_lea.vmem %s1316_s30, 128  ;;  %s1078_s28 = smov [#allocation5]  }
 0x571   : > { %p950_p2 = scmp.ne.s32.totalorder %s1316_s30, %s949_s1  ;;  %s953_s20 = sshll.u32 %s1078_s28, 4  ;;  %s954_s20 = int_to_ptr.vmem [resolvable:$false] %s953_s20 }
 0x572   : > { %s955_s27 = scalar_lea.vmem %s954_s20, 256  ;;  %p956_p6 = scmp.lt.s32.totalorder %s1316_s30, %s954_s20 }
 0x573   : > { %p951_p3 = pnand %p950_p2, %p1214_p12  ;;  %p957_p8 = scmp.lt.s32.totalorder %s955_s27, %s949_s1 }
 0x575   : > { %p952_p5 = pneg %p951_p3  ;;  %p958_p9 = por %p957_p8, %p956_p6 }
 0x577   : > { %p959_p10 = pnand %p958_p9, %p952_p5 }
 0x579   : > { %962 = shalt.err (!%p959_p10)
}
 0x57a   : > { %s963_s11 = scalar_lea.hbm %s608_s14, 128  ;;  %s967_s0 = scalar_lea.hbm %s1385_s6, 1024 }
 0x57b   : > { %p964_p11 = scmp.ne.s32.totalorder %s608_s14, %s963_s11  ;;  %p968_p4 = scmp.lt.u32.totalorder %s608_s14, %s1385_s6 }
 0x57c   : > { %p969_p2 = scmp.lt.u32.totalorder %s967_s0, %s963_s11  ;;  %p971_p13 = scmp.lt.u32.totalorder %s963_s11, %s608_s14 }
 0x57d   : > { %p965_p0 = pnand %p964_p11, %p1214_p12 }
 0x57e   : > { %p970_p3 = por %p969_p2, %p968_p4 }
 0x57f   : > { %p966_p1 = pneg %p965_p0 }
 0x580   : > { %p972_p6 = por %p971_p13, %p970_p3 }
 0x582   : > { %p973_p5 = pnand %p972_p6, %p966_p1 }
 0x584   : > { %976 = shalt.err (!%p973_p5)
}
 0x585   : > { %812 = dma.vmem_to_hbm [thread:$0]  (%p1214_p12), %s1316_s30, 128, %s608_s14, %s582_s15  }
 0x586 PF: > { %p822_p8 = scmp.ge.s32.totalorder %s1071_s7, 2  ;;  %s622_s1 = sand.u32 1, %s1043_s24  }
 0x587   : > { %s623_s19 = scalar_lea.sflag [#allocation4], %s622_s1 }
 0x588   : > { %p816_p9 = pnand %p822_p8, %p1202_p7 }
 0x58a   : > { %1022 = dma.done.wait (!%p816_p9), %s623_s19, 128  }
 0x58b   : > { %1024 = vsyncadd (!%p816_p9), %s623_s19, 4294967168  ;;  %s631_s26 = sand.u32 1, %s1031_s21   ;;  %p1414_p13 = scmp.ne.s32.totalorder %s1408_s29, 0 }
 0x58c   : > { %s632_s16 = scalar_lea.sflag [#allocation6], %s631_s26 }
 0x58d   : > { %p819_p10 = pnand %p822_p8, %p1414_p13 }
 0x58f   : > { %1026 = dma.done.wait (!%p819_p10), %s632_s16, 128  }
 0x590   : > { %1028 = vsyncadd (!%p819_p10), %s632_s16, 4294967168  ;;  %s23_s7 = sadd.s32 1, %s1071_s7   ;;  %s1415_s8 = sld [smem:[#allocation15_spill]] }
 0x591   : > { %p20_p12 = scmp.ge.s32.totalorder %s23_s7, 10   ;;  %s1416_s18 = sld [smem:[#allocation9_spill]] }
 0x592   : > { %s1417_s26 = sld [smem:[#allocation14_spill]]  ;;  %s1418_s27 = sld [smem:[#allocation10_spill]] }
 0x593   : > { %s1419_s28 = sld [smem:[#allocation11_spill]]  ;;  %s1420_s29 = sld [smem:[#allocation12_spill]] }
 0x594   : > { %s1421_s30 = sld [smem:[#allocation13_spill]]  ;;  %s1422_s21 = smov %s1035_s22 }
 0x595   : > { %s1423_s22 = smov %s1039_s23  ;;  %s1425_s24 = smov %s1047_s25 }
 0x596   : > { %s1424_s23 = smov %s1415_s8  ;;  %22 = sbr.rel (!%p20_p12) target bundleno = 12 (0xc), region = 109 }
 0x597   : > { %s1426_s25 = smov %s1416_s18 }
 0x59d   :  { %637 = vsyncpa [#allocation4], 1 }
 0x59e   :  { %639 = vsyncpa [#allocation4 + $0x1], 1 }
 0x59f   :  { %640 = vsyncpa [#allocation6], 1 }
 0x5a0   :  { %642 = vsyncpa [#allocation6 + $0x1], 1 }

</bundles_post_ra>
